<compile_context>
chip_gen: v6e
topology: v6e:2x2x1
jax: 0.10.0
libtpu: 0.0.40
codegen_flags: <defaults>
</compile_context>

<pallas_src>
import jax
import jax.numpy as jnp
from jax.experimental import pallas as pl
from jax.experimental.pallas import tpu as pltpu

HIDDEN = 128
LANE = 128


def _round_up(n, m):
    return (n + m - 1) // m * m


def _cdiv(a, b):
    return (a + b - 1) // b


# ---------------------------------------------------------------------------
# Kernel
# ---------------------------------------------------------------------------
def dqn_kernel(x_ref,
               w1_ref, w2_ref, w3_ref, w4_ref, w5_ref,
               b_ref,
               o_ref):
    """Fully fused 5-layer MLP on one (TM, in_pad) batch tile.

    x_ref:  (TM, in_pad)  bf16
    w*_ref: bf16 weights, VMEM-resident across all grid steps (constant index_map)
    b_ref:  (8, bias_w)   f32, row i = bias of layer i (zero-padded)
    o_ref:  (TM, out_pad) bf16 (or f32), lane-dense store
    """
    n_out = w5_ref.shape[1]

    h = x_ref[...]                                                     # bf16 (TM, in_pad)

    h = jnp.dot(h, w1_ref[...], preferred_element_type=jnp.float32)
    h = jnp.maximum(h + b_ref[0:1, :HIDDEN], 0.0).astype(jnp.bfloat16)

    h = jnp.dot(h, w2_ref[...], preferred_element_type=jnp.float32)
    h = jnp.maximum(h + b_ref[1:2, :HIDDEN], 0.0).astype(jnp.bfloat16)

    h = jnp.dot(h, w3_ref[...], preferred_element_type=jnp.float32)
    h = jnp.maximum(h + b_ref[2:3, :HIDDEN], 0.0).astype(jnp.bfloat16)

    h = jnp.dot(h, w4_ref[...], preferred_element_type=jnp.float32)
    h = jnp.maximum(h + b_ref[3:4, :HIDDEN], 0.0).astype(jnp.bfloat16)

    out = jnp.dot(h, w5_ref[...], preferred_element_type=jnp.float32) + b_ref[4:5, :n_out]
    o_ref[...] = out.astype(o_ref.dtype)                               # lane-dense (TM, out_pad)


# ---------------------------------------------------------------------------
# One-time parameter preparation (hoisted out of the per-call path)
# ---------------------------------------------------------------------------
def prepare_params(params, *, out_dtype=jnp.bfloat16):
    """Cast/pad weights once; pack biases into a single (8, bias_w) f32 operand.

    params: list of 5 (W, b) pairs with W stored (in_features, out_features).
    """
    (w1, b1), (w2, b2), (w3, b3), (w4, b4), (w5, b5) = params
    in_size = w1.shape[0]
    out_size = w5.shape[1]

    in_pad = _round_up(max(in_size, 1), LANE)     # lane-dense first matmul
    out_pad = _round_up(max(out_size, 1), LANE)   # lane-dense output store
    bias_w = max(HIDDEN, out_pad)

    w1p = jnp.zeros((in_pad, HIDDEN), jnp.bfloat16).at[:in_size, :].set(w1.astype(jnp.bfloat16))
    w5p = jnp.zeros((HIDDEN, out_pad), jnp.bfloat16).at[:, :out_size].set(w5.astype(jnp.bfloat16))
    ws = (w1p,
          w2.astype(jnp.bfloat16),
          w3.astype(jnp.bfloat16),
          w4.astype(jnp.bfloat16),
          w5p)

    b_packed = jnp.zeros((8, bias_w), jnp.float32)
    for i, b in enumerate((b1, b2, b3, b4)):
        b_packed = b_packed.at[i, :HIDDEN].set(b.astype(jnp.float32))
    b_packed = b_packed.at[4, :out_size].set(b5.astype(jnp.float32))

    return dict(ws=ws, b_packed=b_packed,
                in_size=in_size, in_pad=in_pad,
                out_size=out_size, out_pad=out_pad,
                out_dtype=out_dtype)


# ---------------------------------------------------------------------------
# Forward wrapper
# ---------------------------------------------------------------------------
def dqn_forward(x, prep, *, tm=1024, unpad=True):
    """x: (B, input_size) f32.  prep: output of prepare_params()."""
    B = x.shape[0]
    in_size, in_pad = prep["in_size"], prep["in_pad"]
    out_size, out_pad = prep["out_size"], prep["out_pad"]
    ws, b_packed = prep["ws"], prep["b_packed"]

    # Batch tile: multiple of 16 (bf16 sublane packing). When there is enough
    # batch, force >=2 grid steps so the "parallel" batch axis spans both
    # TensorCores on v7x; cap at tm (1024 keeps per-step overhead amortized and
    # VMEM use at ~2-3 MB, far below scoped limits on all generations).
    b_min = _round_up(B, 16)
    if B > 16:
        tm_eff = min(tm, _round_up(_cdiv(b_min, 2), 16))
    else:
        tm_eff = min(tm, b_min)
    b_pad = _round_up(B, tm_eff)
    grid = (b_pad // tm_eff,)

    # Per-call input prep only: pad batch + feature dim, cast to bf16.
    x_p = jnp.zeros((b_pad, in_pad), jnp.bfloat16).at[:B, :in_size].set(x.astype(jnp.bfloat16))

    in_specs = [pl.BlockSpec((tm_eff, in_pad), lambda i: (i, 0))]
    for w in ws:
        # Constant block index -> weights DMA'd once, VMEM-resident across steps.
        in_specs.append(pl.BlockSpec(w.shape, lambda i: (0, 0)))
    in_specs.append(pl.BlockSpec(b_packed.shape, lambda i: (0, 0)))

    # TODO(synk): for the act-every-env-step (B~1-8) path, pin weights in VMEM
    # across calls (cross-call prefetch returning a SEMAPHORE+VMEM pair) so the
    # ~100 KB weight DMA leaves the per-step critical path.
    out = pl.pallas_call(
        dqn_kernel,
        out_shape=jax.ShapeDtypeStruct((b_pad, out_pad), prep["out_dtype"]),
        grid=grid,
        in_specs=in_specs,
        out_specs=pl.BlockSpec((tm_eff, out_pad), lambda i: (i, 0)),
        compiler_params=pltpu.CompilerParams(
            dimension_semantics=("parallel",),  # shard batch tiles across v7x's 2 TCs
        ),
    )(x_p, *ws, b_packed)

    if unpad:
        return out[:B, :out_size]
    return out  # padded (b_pad, out_pad); slice lazily at the consumer


# ---------------------------------------------------------------------------
# Init + references
# ---------------------------------------------------------------------------
def init_params(key, input_size, output_size):
    """Deterministic init; weights stored as (in_features, out_features)."""
    dims = [(input_size, HIDDEN), (HIDDEN, HIDDEN), (HIDDEN, HIDDEN),
            (HIDDEN, HIDDEN), (HIDDEN, output_size)]
    params = []
    for (fan_in, fan_out) in dims:
        key, kw, kb = jax.random.split(key, 3)
        bound = 1.0 / jnp.sqrt(fan_in)  # torch nn.Linear default uniform bound
        w = jax.random.uniform(kw, (fan_in, fan_out), jnp.float32, -bound, bound)
        b = jax.random.uniform(kb, (fan_out,), jnp.float32, -bound, bound)
        params.append((w, b))
    return params


def dqn_reference(x, params):
    """Pure f32 reference (matches the torch module semantics)."""
    h = x
    for i, (w, b) in enumerate(params):
        h = h @ w + b
        if i < len(params) - 1:
            h = jnp.maximum(h, 0.0)
    return h


def dqn_reference_bf16(x, params):
    """Mirrors the kernel's precision policy: bf16 matmul inputs, f32 accumulation."""
    h = x.astype(jnp.bfloat16)
    for i, (w, b) in enumerate(params):
        h = jnp.dot(h, w.astype(jnp.bfloat16), preferred_element_type=jnp.float32) + b
        if i < len(params) - 1:
            h = jnp.maximum(h, 0.0).astype(jnp.bfloat16)
    return h


if __name__ == "__main__":
    key = jax.random.PRNGKey(0)
    k_params, k_x = jax.random.split(key)

    batch, input_size, output_size = 8, 16, 4
    params = init_params(k_params, input_size, output_size)
    x = jax.random.normal(k_x, (batch, input_size), jnp.float32)

    prep = prepare_params(params)                 # one-time weight cast/pad/pack
    out = jax.block_until_ready(dqn_forward(x, prep))

    # References: same precision policy (bf16 matmuls + bf16 final store) and
    # the original f32 module semantics.
    ref_bf16 = dqn_reference_bf16(x, params).astype(prep["out_dtype"]).astype(jnp.float32)
    ref_f32 = dqn_reference(x, params)
    out_f32 = out.astype(jnp.float32)

    assert out.shape == (batch, output_size)
    assert jnp.allclose(out_f32, ref_bf16, atol=2e-2, rtol=2e-2), "mismatch vs bf16-matched reference"
    assert jnp.allclose(out_f32, ref_f32, atol=6e-2, rtol=6e-2), "mismatch vs f32 reference"

    print("KERNEL_OK")
</pallas_src>

<mosaic_0001>
module attributes {stable_mosaic.version = 11 : i64} {
  func.func @dqn_kernel(%arg0: i32, %arg1: memref<16x128xbf16, #tpu.memory_space<vmem>>, %arg2: memref<128x128xbf16, #tpu.memory_space<vmem>>, %arg3: memref<128x128xbf16, #tpu.memory_space<vmem>>, %arg4: memref<128x128xbf16, #tpu.memory_space<vmem>>, %arg5: memref<128x128xbf16, #tpu.memory_space<vmem>>, %arg6: memref<128x128xbf16, #tpu.memory_space<vmem>>, %arg7: memref<8x128xf32, #tpu.memory_space<vmem>>, %arg8: memref<16x128xbf16, #tpu.memory_space<vmem>>) attributes {dimension_semantics = [#tpu.dimension_semantics<parallel>], iteration_bounds = array<i64: 1>, scalar_prefetch = 0 : i64, scratch_operands = 0 : i64, tpu.core_type = #tpu.core_type<tc>, window_params = [{transform_indices = @transform_0, window_bounds = array<i64: 16, 128>}, {pipeline_mode = #tpu.pipeline_mode<synchronous>, transform_indices = @transform_1, window_bounds = array<i64: 128, 128>}, {pipeline_mode = #tpu.pipeline_mode<synchronous>, transform_indices = @transform_2, window_bounds = array<i64: 128, 128>}, {pipeline_mode = #tpu.pipeline_mode<synchronous>, transform_indices = @transform_3, window_bounds = array<i64: 128, 128>}, {pipeline_mode = #tpu.pipeline_mode<synchronous>, transform_indices = @transform_4, window_bounds = array<i64: 128, 128>}, {pipeline_mode = #tpu.pipeline_mode<synchronous>, transform_indices = @transform_5, window_bounds = array<i64: 128, 128>}, {pipeline_mode = #tpu.pipeline_mode<synchronous>, transform_indices = @transform_6, window_bounds = array<i64: 8, 128>}, {transform_indices = @transform_7, window_bounds = array<i64: 16, 128>}]} {
    %c0 = arith.constant 0 : index
    %c0_0 = arith.constant 0 : index
    %0 = vector.load %arg1[%c0, %c0_0] : memref<16x128xbf16, #tpu.memory_space<vmem>>, vector<16x128xbf16>
    %c0_1 = arith.constant 0 : index
    %c0_2 = arith.constant 0 : index
    %1 = vector.load %arg2[%c0_1, %c0_2] : memref<128x128xbf16, #tpu.memory_space<vmem>>, vector<128x128xbf16>
    %cst = arith.constant dense<0.000000e+00> : vector<16x128xf32>
    %2 = tpu.matmul %0, %1, %cst {dimension_numbers = #tpu.dot_dimension_numbers<[1], [0], [0], [1], [0, 0, 1, 1], [], []>} : vector<16x128xbf16>, vector<128x128xbf16>, vector<16x128xf32> -> vector<16x128xf32>
    %c0_3 = arith.constant 0 : index
    %c0_4 = arith.constant 0 : index
    %3 = vector.load %arg7[%c0_3, %c0_4] : memref<8x128xf32, #tpu.memory_space<vmem>>, vector<1x128xf32>
    %4 = vector.broadcast %3 : vector<1x128xf32> to vector<16x128xf32>
    %5 = arith.addf %2, %4 : vector<16x128xf32>
    %cst_5 = arith.constant 0.000000e+00 : f32
    %6 = vector.broadcast %cst_5 : f32 to vector<16x128xf32>
    %7 = arith.maximumf %5, %6 : vector<16x128xf32>
    %8 = arith.truncf %7 : vector<16x128xf32> to vector<16x128xbf16>
    %c0_6 = arith.constant 0 : index
    %c0_7 = arith.constant 0 : index
    %9 = vector.load %arg3[%c0_6, %c0_7] : memref<128x128xbf16, #tpu.memory_space<vmem>>, vector<128x128xbf16>
    %cst_8 = arith.constant dense<0.000000e+00> : vector<16x128xf32>
    %10 = tpu.matmul %8, %9, %cst_8 {dimension_numbers = #tpu.dot_dimension_numbers<[1], [0], [0], [1], [0, 0, 1, 1], [], []>} : vector<16x128xbf16>, vector<128x128xbf16>, vector<16x128xf32> -> vector<16x128xf32>
    %c1 = arith.constant 1 : index
    %c0_9 = arith.constant 0 : index
    %11 = vector.load %arg7[%c1, %c0_9] : memref<8x128xf32, #tpu.memory_space<vmem>>, vector<1x128xf32>
    %12 = vector.broadcast %11 : vector<1x128xf32> to vector<16x128xf32>
    %13 = arith.addf %10, %12 : vector<16x128xf32>
    %cst_10 = arith.constant 0.000000e+00 : f32
    %14 = vector.broadcast %cst_10 : f32 to vector<16x128xf32>
    %15 = arith.maximumf %13, %14 : vector<16x128xf32>
    %16 = arith.truncf %15 : vector<16x128xf32> to vector<16x128xbf16>
    %c0_11 = arith.constant 0 : index
    %c0_12 = arith.constant 0 : index
    %17 = vector.load %arg4[%c0_11, %c0_12] : memref<128x128xbf16, #tpu.memory_space<vmem>>, vector<128x128xbf16>
    %cst_13 = arith.constant dense<0.000000e+00> : vector<16x128xf32>
    %18 = tpu.matmul %16, %17, %cst_13 {dimension_numbers = #tpu.dot_dimension_numbers<[1], [0], [0], [1], [0, 0, 1, 1], [], []>} : vector<16x128xbf16>, vector<128x128xbf16>, vector<16x128xf32> -> vector<16x128xf32>
    %c2 = arith.constant 2 : index
    %c0_14 = arith.constant 0 : index
    %19 = vector.load %arg7[%c2, %c0_14] : memref<8x128xf32, #tpu.memory_space<vmem>>, vector<1x128xf32>
    %20 = vector.broadcast %19 : vector<1x128xf32> to vector<16x128xf32>
    %21 = arith.addf %18, %20 : vector<16x128xf32>
    %cst_15 = arith.constant 0.000000e+00 : f32
    %22 = vector.broadcast %cst_15 : f32 to vector<16x128xf32>
    %23 = arith.maximumf %21, %22 : vector<16x128xf32>
    %24 = arith.truncf %23 : vector<16x128xf32> to vector<16x128xbf16>
    %c0_16 = arith.constant 0 : index
    %c0_17 = arith.constant 0 : index
    %25 = vector.load %arg5[%c0_16, %c0_17] : memref<128x128xbf16, #tpu.memory_space<vmem>>, vector<128x128xbf16>
    %cst_18 = arith.constant dense<0.000000e+00> : vector<16x128xf32>
    %26 = tpu.matmul %24, %25, %cst_18 {dimension_numbers = #tpu.dot_dimension_numbers<[1], [0], [0], [1], [0, 0, 1, 1], [], []>} : vector<16x128xbf16>, vector<128x128xbf16>, vector<16x128xf32> -> vector<16x128xf32>
    %c3 = arith.constant 3 : index
    %c0_19 = arith.constant 0 : index
    %27 = vector.load %arg7[%c3, %c0_19] : memref<8x128xf32, #tpu.memory_space<vmem>>, vector<1x128xf32>
    %28 = vector.broadcast %27 : vector<1x128xf32> to vector<16x128xf32>
    %29 = arith.addf %26, %28 : vector<16x128xf32>
    %cst_20 = arith.constant 0.000000e+00 : f32
    %30 = vector.broadcast %cst_20 : f32 to vector<16x128xf32>
    %31 = arith.maximumf %29, %30 : vector<16x128xf32>
    %32 = arith.truncf %31 : vector<16x128xf32> to vector<16x128xbf16>
    %c0_21 = arith.constant 0 : index
    %c0_22 = arith.constant 0 : index
    %33 = vector.load %arg6[%c0_21, %c0_22] : memref<128x128xbf16, #tpu.memory_space<vmem>>, vector<128x128xbf16>
    %cst_23 = arith.constant dense<0.000000e+00> : vector<16x128xf32>
    %34 = tpu.matmul %32, %33, %cst_23 {dimension_numbers = #tpu.dot_dimension_numbers<[1], [0], [0], [1], [0, 0, 1, 1], [], []>} : vector<16x128xbf16>, vector<128x128xbf16>, vector<16x128xf32> -> vector<16x128xf32>
    %c4 = arith.constant 4 : index
    %c0_24 = arith.constant 0 : index
    %35 = vector.load %arg7[%c4, %c0_24] : memref<8x128xf32, #tpu.memory_space<vmem>>, vector<1x128xf32>
    %36 = vector.broadcast %35 : vector<1x128xf32> to vector<16x128xf32>
    %37 = arith.addf %34, %36 : vector<16x128xf32>
    %38 = arith.truncf %37 : vector<16x128xf32> to vector<16x128xbf16>
    %c0_25 = arith.constant 0 : index
    %c0_26 = arith.constant 0 : index
    %39 = vector.load %arg8[%c0_25, %c0_26] : memref<16x128xbf16, #tpu.memory_space<vmem>>, vector<16x128xbf16>
    tpu.vector_store %arg8[%c0_25, %c0_26], %38 {strides = array<i32>} : memref<16x128xbf16, #tpu.memory_space<vmem>>, vector<16x128xbf16>,
    return
  }
  func.func @transform_0(%arg0: i32) -> (i32, i32) {
    %c0_i32 = arith.constant 0 : i32
    %c0_i32_0 = arith.constant 0 : i32
    return %arg0, %c0_i32 : i32, i32
  }
  func.func @transform_1(%arg0: i32) -> (i32, i32) {
    %c0_i32 = arith.constant 0 : i32
    %c0_i32_0 = arith.constant 0 : i32
    %c0_i32_1 = arith.constant 0 : i32
    return %c0_i32, %c0_i32_0 : i32, i32
  }
  func.func @transform_2(%arg0: i32) -> (i32, i32) {
    %c0_i32 = arith.constant 0 : i32
    %c0_i32_0 = arith.constant 0 : i32
    %c0_i32_1 = arith.constant 0 : i32
    return %c0_i32, %c0_i32_0 : i32, i32
  }
  func.func @transform_3(%arg0: i32) -> (i32, i32) {
    %c0_i32 = arith.constant 0 : i32
    %c0_i32_0 = arith.constant 0 : i32
    %c0_i32_1 = arith.constant 0 : i32
    return %c0_i32, %c0_i32_0 : i32, i32
  }
  func.func @transform_4(%arg0: i32) -> (i32, i32) {
    %c0_i32 = arith.constant 0 : i32
    %c0_i32_0 = arith.constant 0 : i32
    %c0_i32_1 = arith.constant 0 : i32
    return %c0_i32, %c0_i32_0 : i32, i32
  }
  func.func @transform_5(%arg0: i32) -> (i32, i32) {
    %c0_i32 = arith.constant 0 : i32
    %c0_i32_0 = arith.constant 0 : i32
    %c0_i32_1 = arith.constant 0 : i32
    return %c0_i32, %c0_i32_0 : i32, i32
  }
  func.func @transform_6(%arg0: i32) -> (i32, i32) {
    %c0_i32 = arith.constant 0 : i32
    %c0_i32_0 = arith.constant 0 : i32
    %c0_i32_1 = arith.constant 0 : i32
    return %c0_i32, %c0_i32_0 : i32, i32
  }
  func.func @transform_7(%arg0: i32) -> (i32, i32) {
    %c0_i32 = arith.constant 0 : i32
    %c0_i32_0 = arith.constant 0 : i32
    return %arg0, %c0_i32 : i32, i32
  }
}

</mosaic_0001>

<bundles_post_ra>
// kernel: tpu_custom_call.1
= control target key start
LH: loop header
LB: loop body
LE: loop exit
PB: predicated region body
PF: predicated region fallthrough
CT: control target
= control target key end

     0   :  { %12 = vsyncpa [#allocation3], 0  ;;  %s1270_s0 = inlined_call_operand.hbm [shape: bf16[16,128], index: 0, kind: input, shape index: {}]   ;;  %s1271_s1 = inlined_call_operand.hbm [shape: bf16[128,128], index: 1, kind: input, shape index: {}]   ;;  %s1272_s2 = inlined_call_operand.hbm [shape: bf16[128,128], index: 2, kind: input, shape index: {}]   ;;  %s1273_s3 = inlined_call_operand.hbm [shape: bf16[128,128], index: 3, kind: input, shape index: {}]   ;;  %s1274_s4 = inlined_call_operand.hbm [shape: bf16[128,128], index: 4, kind: input, shape index: {}]   ;;  %s1275_s5 = inlined_call_operand.hbm [shape: bf16[128,128], index: 5, kind: input, shape index: {}]   ;;  %s1276_s6 = inlined_call_operand.vmem [shape: f32[8,128], index: 6, kind: input, shape index: {}]   ;;  %s1277_s7 = inlined_call_operand.hbm [shape: bf16[16,128], index: 7, kind: output, shape index: {}]  }
   0x1   :  { %13 = vsyncpa [#allocation6], 0 }
   0x2   :  { %14 = vsyncpa [#allocation9], 0 }
   0x3   :  { %15 = vsyncpa [#allocation12], 0 }
   0x4   :  { %16 = vsyncpa [#allocation4], 0  ;;  %s1112_s24 = smov [#allocation5]   ;;  %s1113_s26 = smov [#allocation8]  }
   0x5   :  { %s34_s25 = sshll.u32 %s1112_s24, 4  ;;  %s58_s27 = sshll.u32 %s1113_s26, 4  ;;  %s35_s25 = int_to_ptr.vmem [resolvable:$true] %s34_s25  ;;  %s59_s27 = int_to_ptr.vmem [resolvable:$true] %s58_s27 }
   0x6   :  { %s970_s28 = scalar_lea.vmem %s35_s25, 1024  ;;  %p975_p1 = scmp.lt.s32.totalorder %s35_s25, %s35_s25 }
   0x7   :  { %p971_p0 = scmp.ne.s32.totalorder %s35_s25, %s970_s28  ;;  %p976_p2 = scmp.lt.s32.totalorder %s970_s28, %s970_s28 }
   0x9   :  { %p977_p3 = por %p976_p2, %p975_p1 }
   0xb   :  { %p978_p4 = pnand %p977_p3, %p971_p0 }
   0xd   :  { %981 = shalt.err (!%p978_p4)
}
   0xe   :  { %s1114_s29 = smov 64   ;;  %s1115_s30 = smov 4  }
   0xf   :  { %40 = dma.hbm_to_vmem [thread:$0]  %s1271_s1, 1024, %s35_s25, [#allocation6], %s1114_s29, %s1114_s29, %s1115_s30  }
  0x10   :  { %s990_s10 = scalar_lea.vmem %s59_s27, 1024  ;;  %p995_p6 = scmp.lt.s32.totalorder %s59_s27, %s59_s27 }
  0x11   :  { %p991_p5 = scmp.ne.s32.totalorder %s59_s27, %s990_s10  ;;  %p996_p7 = scmp.lt.s32.totalorder %s990_s10, %s990_s10 }
  0x13   :  { %p997_p8 = por %p996_p7, %p995_p6 }
  0x15   :  { %p998_p9 = pnand %p997_p8, %p991_p5 }
  0x17   :  { %1001 = shalt.err (!%p998_p9)
}
  0x18   :  { %64 = dma.hbm_to_vmem [thread:$0]  %s1273_s3, 1024, %s59_s27, [#allocation9], %s1114_s29, %s1114_s29, %s1115_s30  }
  0x19   :  { %s1116_s13 = smov [#allocation2]   ;;  %s1117_s15 = smov [#allocation7]  }
  0x1a   :  { %s22_s14 = sshll.u32 %s1116_s13, 4  ;;  %s46_s16 = sshll.u32 %s1117_s15, 4  ;;  %s23_s14 = int_to_ptr.vmem [resolvable:$true] %s22_s14  ;;  %s47_s16 = int_to_ptr.vmem [resolvable:$true] %s46_s16 }
  0x1b   :  { %s1010_s1 = scalar_lea.vmem %s23_s14, 128  ;;  %p1015_p11 = scmp.lt.s32.totalorder %s23_s14, %s23_s14 }
  0x1c   :  { %p1011_p10 = scmp.ne.s32.totalorder %s23_s14, %s1010_s1  ;;  %p1016_p12 = scmp.lt.s32.totalorder %s1010_s1, %s1010_s1 }
  0x1e   :  { %p1017_p13 = por %p1016_p12, %p1015_p11 }
  0x20   :  { %p1018_p0 = pnand %p1017_p13, %p1011_p10 }
  0x22   :  { %1021 = shalt.err (!%p1018_p0)
}
  0x23   :  { %28 = dma.hbm_to_vmem [thread:$0]  %s1270_s0, 128, %s23_s14, [#allocation3], %s1114_s29, %s1114_s29, %s1115_s30  }
  0x24   :  { %s1030_s3 = scalar_lea.vmem %s47_s16, 1024  ;;  %p1035_p2 = scmp.lt.s32.totalorder %s47_s16, %s47_s16 }
  0x25   :  { %p1031_p1 = scmp.ne.s32.totalorder %s47_s16, %s1030_s3  ;;  %p1036_p3 = scmp.lt.s32.totalorder %s1030_s3, %s1030_s3 }
  0x27   :  { %p1037_p4 = por %p1036_p3, %p1035_p2 }
  0x29   :  { %p1038_p5 = pnand %p1037_p4, %p1031_p1 }
  0x2b   :  { %1041 = shalt.err (!%p1038_p5)
}
  0x2c   :  { %52 = dma.hbm_to_vmem [thread:$0]  %s1272_s2, 1024, %s47_s16, [#allocation6], %s1114_s29, %s1114_s29, %s1115_s30  }
  0x2d   :  { %s1118_s21 = smov [#allocation10]   ;;  %s1119_s23 = smov [#allocation11]  }
  0x2e   :  { %s70_s22 = sshll.u32 %s1118_s21, 4  ;;  %s82_s24 = sshll.u32 %s1119_s23, 4  ;;  %s71_s22 = int_to_ptr.vmem [resolvable:$true] %s70_s22  ;;  %s83_s24 = int_to_ptr.vmem [resolvable:$true] %s82_s24 }
  0x2f   :  { %s1050_s0 = scalar_lea.vmem %s71_s22, 1024  ;;  %p1055_p7 = scmp.lt.s32.totalorder %s71_s22, %s71_s22 }
  0x30   :  { %p1051_p6 = scmp.ne.s32.totalorder %s71_s22, %s1050_s0  ;;  %p1056_p8 = scmp.lt.s32.totalorder %s1050_s0, %s1050_s0 }
  0x32   :  { %p1057_p9 = por %p1056_p8, %p1055_p7 }
  0x34   :  { %p1058_p10 = pnand %p1057_p9, %p1051_p6 }
  0x36   :  { %1061 = shalt.err (!%p1058_p10)
}
  0x37   :  { %76 = dma.hbm_to_vmem [thread:$0]  %s1274_s4, 1024, %s71_s22, [#allocation9], %s1114_s29, %s1114_s29, %s1115_s30  }
  0x38   :  { %s1070_s2 = scalar_lea.vmem %s83_s24, 1024  ;;  %p1075_p12 = scmp.lt.s32.totalorder %s83_s24, %s83_s24 }
  0x39   :  { %p1071_p11 = scmp.ne.s32.totalorder %s83_s24, %s1070_s2  ;;  %p1076_p13 = scmp.lt.s32.totalorder %s1070_s2, %s1070_s2 }
  0x3b   :  { %p1077_p0 = por %p1076_p13, %p1075_p12 }
  0x3d   :  { %p1078_p1 = pnand %p1077_p0, %p1071_p11 }
  0x3f   :  { %1081 = shalt.err (!%p1078_p1)
}
  0x40   :  { %88 = dma.hbm_to_vmem [thread:$0]  %s1275_s5, 1024, %s83_s24, [#allocation12], %s1114_s29, %s1114_s29, %s1115_s30  }
  0x41   :  { %1102 = dma.done.wait [#allocation3], 128  }
  0x42   :  { %1103 = vsyncadd [#allocation3], 4294967168 }
  0x43   :  { %1104 = dma.done.wait [#allocation6], 2048  }
  0x44   :  { %1105 = vsyncadd [#allocation6], 4294965248 }
  0x45   :  { %1106 = dma.done.wait [#allocation9], 2048  }
  0x46   :  { %1107 = vsyncadd [#allocation9], 4294965248 }
  0x47   :  { %1108 = dma.done.wait [#allocation12], 1024  }
  0x48   :  { %1109 = vsyncadd [#allocation12], 4294966272  ;;  %v1120_v0 = vmov 0.0   ;;  %vm1121_vm0 = vmmov 0   ;;  %v921_v1 = vld [vmem:[#allocation5 + $0x38] sm:$0xff]   ;;  %v922_v2 = vld [vmem:[#allocation5 + $0x30] sm:$0xff]  }
  0x49   :  { %810 = vmatprep.subr.bf16.mxu0 %v1120_v0  ;;  %826 = vmatprep.mubr.msk.bf16.mxu0 %vm1121_vm0, %v1120_v0  ;;  %v923_v3 = vld [vmem:[#allocation5 + $0x28] sm:$0xff]   ;;  %v930_v4 = vld [vmem:[#allocation7 + $0x38] sm:$0xff]   ;;  %v924_v5 = vld [vmem:[#allocation5 + $0x20] sm:$0xff]   ;;  %s1122_s16 = smov [#allocation13]  }
  0x4a   :  { %830 = vmatprep.subr.bf16.mxu1 %v1120_v0  ;;  %846 = vmatprep.mubr.msk.bf16.mxu1 %vm1121_vm0, %v1120_v0  ;;  %v931_v6 = vld [vmem:[#allocation7 + $0x30] sm:$0xff]   ;;  %v925_v7 = vld [vmem:[#allocation5 + $0x18] sm:$0xff]   ;;  %v932_v8 = vld [vmem:[#allocation7 + $0x28] sm:$0xff]   ;;  %s695_s1 = sshll.u32 %s1122_s16, 4  ;;  %s696_s1 = int_to_ptr.vmem [resolvable:$true] %s695_s1 }
  0x4b   :  { %811 = vmatpush3.bf16.msra.mxu0 %v921_v1  ;;  %831 = vmatpush3.bf16.msra.mxu1 %v930_v4  ;;  %v926_v9 = vld [vmem:[#allocation5 + $0x10] sm:$0xff]   ;;  %v933_v10 = vld [vmem:[#allocation7 + $0x20] sm:$0xff]   ;;  %v927_v11 = vld [vmem:[#allocation5 + $0x8] sm:$0xff]   ;;  %s1082_s17 = scalar_lea.vmem %s696_s1, 128  ;;  %p1087_p3 = scmp.lt.s32.totalorder %s696_s1, %s696_s1 }
  0x4c   :  { %812 = vmatprep.subr.bf16.mxu0 %v1120_v0  ;;  %832 = vmatprep.subr.bf16.mxu1 %v1120_v0  ;;  %v934_v12 = vld [vmem:[#allocation7 + $0x18] sm:$0xff]   ;;  %v928_v13 = vld [vmem:[#allocation5] sm:$0xff]   ;;  %v935_v15 = vld [vmem:[#allocation7 + $0x10] sm:$0xff]   ;;  %p1083_p2 = scmp.ne.s32.totalorder %s696_s1, %s1082_s17  ;;  %p1088_p4 = scmp.lt.s32.totalorder %s1082_s17, %s1082_s17 }
  0x4d   :  { %v929_v14 = vld [vmem:[#allocation2] sm:$0xff]   ;;  %v936_v16 = vld [vmem:[#allocation7 + $0x8] sm:$0xff]   ;;  %v937_v17 = vld [vmem:[#allocation7] sm:$0xff]  }
  0x4e   :  { %v938_v18 = vld [vmem:[#allocation8 + $0x38] sm:$0xff]   ;;  %v939_v19 = vld [vmem:[#allocation8 + $0x30] sm:$0xff]   ;;  %v940_v20 = vld [vmem:[#allocation8 + $0x28] sm:$0xff]   ;;  %p1089_p5 = por %p1088_p4, %p1087_p3 }
  0x4f   :  { %813 = vmatpush3.bf16.msra.mxu0 %v922_v2  ;;  %833 = vmatpush3.bf16.msra.mxu1 %v931_v6  ;;  %v941_v21 = vld [vmem:[#allocation8 + $0x20] sm:$0xff]   ;;  %v942_v22 = vld [vmem:[#allocation8 + $0x18] sm:$0xff]   ;;  %v943_v33 = vld [vmem:[#allocation8 + $0x10] sm:$0xff]  }
  0x50   :  { %814 = vmatprep.subr.bf16.mxu0 %v1120_v0  ;;  %834 = vmatprep.subr.bf16.mxu1 %v1120_v0  ;;  %v710_v23 = vld [vmem:[%s1276_s6] ss:$0 sm:$0xff]  ;;  %v944_v34 = vld [vmem:[#allocation8 + $0x8] sm:$0xff]   ;;  %v945_v35 = vld [vmem:[#allocation8] sm:$0xff]   ;;  %p1090_p6 = pnand %p1089_p5, %p1083_p2 }
  0x51   :  { %v946_v36 = vld [vmem:[#allocation10 + $0x38] sm:$0xff]   ;;  %v947_v37 = vld [vmem:[#allocation10 + $0x30] sm:$0xff]   ;;  %v948_v38 = vld [vmem:[#allocation10 + $0x28] sm:$0xff]  }
  0x52   :  { %v949_v39 = vld [vmem:[#allocation10 + $0x20] sm:$0xff]   ;;  %v950_v40 = vld [vmem:[#allocation10 + $0x18] sm:$0xff]   ;;  %v951_v51 = vld [vmem:[#allocation10 + $0x10] sm:$0xff]  }
  0x53   :  { %815 = vmatpush3.bf16.msra.mxu0 %v923_v3  ;;  %835 = vmatpush3.bf16.msra.mxu1 %v932_v8  ;;  %v720_v41 = vld [vmem:[%s1276_s6 + $0x1] ss:$0 sm:$0xff]  ;;  %v952_v52 = vld [vmem:[#allocation10 + $0x8] sm:$0xff]   ;;  %v953_v53 = vld [vmem:[#allocation10] sm:$0xff]  }
  0x54   :  { %816 = vmatprep.subr.bf16.mxu0 %v1120_v0  ;;  %836 = vmatprep.subr.bf16.mxu1 %v1120_v0  ;;  %v954_v54 = vld [vmem:[#allocation11 + $0x38] sm:$0xff]   ;;  %v955_v55 = vld [vmem:[#allocation11 + $0x30] sm:$0xff]   ;;  %v956_v56 = vld [vmem:[#allocation11 + $0x28] sm:$0xff]  }
  0x55   :  { %v957_v57 = vld [vmem:[#allocation11 + $0x20] sm:$0xff]   ;;  %v958_v58 = vld [vmem:[#allocation11 + $0x18] sm:$0xff]   ;;  %v959_v6 = vld [vmem:[#allocation11 + $0x10] sm:$0xff]  }
  0x56   :  { %v729_v59 = vld [vmem:[%s1276_s6 + $0x2] ss:$0 sm:$0xff]  ;;  %v961_v8 = vld [vmem:[#allocation11] sm:$0xff]  }
  0x57   :  { %817 = vmatpush3.bf16.msra.mxu0 %v924_v5  ;;  %837 = vmatpush3.bf16.msra.mxu1 %v933_v10 }
  0x58   :  { %818 = vmatprep.subr.bf16.mxu0 %v1120_v0  ;;  %838 = vmatprep.subr.bf16.mxu1 %v1120_v0 }
  0x5b   :  { %819 = vmatpush3.bf16.msra.mxu0 %v925_v7  ;;  %839 = vmatpush3.bf16.msra.mxu1 %v934_v12  ;;  %v960_v7 = vld [vmem:[#allocation11 + $0x8] sm:$0xff]  }
  0x5c   :  { %820 = vmatprep.subr.bf16.mxu0 %v1120_v0  ;;  %840 = vmatprep.subr.bf16.mxu1 %v1120_v0 }
  0x5f   :  { %821 = vmatpush3.bf16.msra.mxu0 %v926_v9  ;;  %841 = vmatpush3.bf16.msra.mxu1 %v935_v15  ;;  %v738_v9 = vld [vmem:[%s1276_s6 + $0x3] ss:$0 sm:$0xff] }
  0x60   :  { %822 = vmatprep.subr.bf16.mxu0 %v1120_v0  ;;  %842 = vmatprep.subr.bf16.mxu1 %v1120_v0 }
  0x63   :  { %823 = vmatpush3.bf16.msra.mxu0 %v927_v11  ;;  %843 = vmatpush3.bf16.msra.mxu1 %v936_v16 }
  0x64   :  { %824 = vmatprep.subr.bf16.mxu0 %v1120_v0  ;;  %844 = vmatprep.subr.bf16.mxu1 %v1120_v0 }
  0x67   :  { %825 = vmatpush3.bf16.msra.mxu0 %v928_v13  ;;  %845 = vmatpush3.bf16.msra.mxu1 %v937_v17 }
  0x68   :  { %850 = vmatprep.subr.bf16.mxu0 %v1120_v0  ;;  %870 = vmatprep.subr.bf16.mxu1 %v1120_v0 }
  0x6a   :  { %827 = vmatmul.mubr.bf16.vlgmr.msra.gmra.mxu0 %v929_v14 }
  0x6b   :  { %866 = vmatprep.mubr.msk.bf16.mxu0 %vm1121_vm0, %v1120_v0  ;;  %851 = vmatpush3.bf16.msra.mxu0 %v938_v18 }
  0x6c   :  { %852 = vmatprep.subr.bf16.mxu0 %v1120_v0 }
  0x6f   :  { %853 = vmatpush3.bf16.msra.mxu0 %v939_v19 }
  0x70   :  { %854 = vmatprep.subr.bf16.mxu0 %v1120_v0 }
  0x73   :  { %855 = vmatpush3.bf16.msra.mxu0 %v940_v20 }
  0x74   :  { %856 = vmatprep.subr.bf16.mxu0 %v1120_v0 }
  0x77   :  { %857 = vmatpush3.bf16.msra.mxu0 %v941_v21 }
  0x78   :  { %858 = vmatprep.subr.bf16.mxu0 %v1120_v0 }
  0x7b   :  { %859 = vmatpush3.bf16.msra.mxu0 %v942_v22 }
  0x7c   :  { %860 = vmatprep.subr.bf16.mxu0 %v1120_v0 }
  0x7f   :  { %861 = vmatpush3.bf16.msra.mxu0 %v943_v33 }
  0x80   :  { %862 = vmatprep.subr.bf16.mxu0 %v1120_v0 }
  0x83   :  { %863 = vmatpush3.bf16.msra.mxu0 %v944_v34 }
  0x84   :  { %864 = vmatprep.subr.bf16.mxu0 %v1120_v0 }
  0x87   :  { %865 = vmatpush3.bf16.msra.mxu0 %v945_v35 }
  0x88   :  { %890 = vmatprep.subr.bf16.mxu0 %v1120_v0 }
 0x12a   :  { %v221_v24 = vpop.f32.mrf.mxu0 }
 0x12b   :  { %v222_v26 = vadd.f32 %v710_v23, %v221_v24 }
 0x12c   :  { %v828_v25 = vpop.f32.mrf.mxu0 }
 0x12d   :  { %v228_v30 = vmax.f32 %v222_v26, 0.0 }
 0x12e   :  { %v224_v27 = vpop.f32.mrf.mxu0 }
 0x12f   :  { %v225_v28 = vadd.f32 %v710_v23, %v224_v27 }
 0x130   :  { %v829_v29 = vpop.f32.mrf.mxu0 }
 0x131   :  { %v229_v31 = vmax.f32 %v225_v28, 0.0 }
 0x133   :  { %v230_v32 = vpack.c.bf16 %v229_v31, %v228_v30 }
 0x135   :  { %847 = vmatmul.mubr.bf16.vlgmr.msra.gmra.mxu1 %v230_v32 }
 0x136   :  { %886 = vmatprep.mubr.msk.bf16.mxu1 %vm1121_vm0, %v1120_v0  ;;  %871 = vmatpush3.bf16.msra.mxu1 %v946_v36 }
 0x137   :  { %872 = vmatprep.subr.bf16.mxu1 %v1120_v0 }
 0x13a   :  { %873 = vmatpush3.bf16.msra.mxu1 %v947_v37 }
 0x13b   :  { %874 = vmatprep.subr.bf16.mxu1 %v1120_v0 }
 0x13e   :  { %875 = vmatpush3.bf16.msra.mxu1 %v948_v38 }
 0x13f   :  { %876 = vmatprep.subr.bf16.mxu1 %v1120_v0 }
 0x142   :  { %877 = vmatpush3.bf16.msra.mxu1 %v949_v39 }
 0x143   :  { %878 = vmatprep.subr.bf16.mxu1 %v1120_v0 }
 0x146   :  { %879 = vmatpush3.bf16.msra.mxu1 %v950_v40 }
 0x147   :  { %880 = vmatprep.subr.bf16.mxu1 %v1120_v0 }
 0x14a   :  { %881 = vmatpush3.bf16.msra.mxu1 %v951_v51 }
 0x14b   :  { %882 = vmatprep.subr.bf16.mxu1 %v1120_v0 }
 0x14e   :  { %883 = vmatpush3.bf16.msra.mxu1 %v952_v52 }
 0x14f   :  { %884 = vmatprep.subr.bf16.mxu1 %v1120_v0 }
 0x152   :  { %885 = vmatpush3.bf16.msra.mxu1 %v953_v53 }
 0x1f5   :  { %v334_v42 = vpop.f32.mrf.mxu1 }
 0x1f6   :  { %v335_v44 = vadd.f32 %v720_v41, %v334_v42 }
 0x1f7   :  { %v848_v43 = vpop.f32.mrf.mxu1 }
 0x1f8   :  { %v341_v48 = vmax.f32 %v335_v44, 0.0 }
 0x1f9   :  { %v337_v45 = vpop.f32.mrf.mxu1 }
 0x1fa   :  { %v338_v46 = vadd.f32 %v720_v41, %v337_v45 }
 0x1fb   :  { %v849_v47 = vpop.f32.mrf.mxu1 }
 0x1fc   :  { %v342_v49 = vmax.f32 %v338_v46, 0.0 }
 0x1fe   :  { %v343_v50 = vpack.c.bf16 %v342_v49, %v341_v48 }
 0x200   :  { %867 = vmatmul.mubr.bf16.vlgmr.msra.gmra.mxu0 %v343_v50 }
 0x201   :  { %906 = vmatprep.mubr.msk.bf16.mxu0 %vm1121_vm0, %v1120_v0  ;;  %891 = vmatpush3.bf16.msra.mxu0 %v954_v54 }
 0x202   :  { %892 = vmatprep.subr.bf16.mxu0 %v1120_v0 }
 0x205   :  { %893 = vmatpush3.bf16.msra.mxu0 %v955_v55 }
 0x206   :  { %894 = vmatprep.subr.bf16.mxu0 %v1120_v0 }
 0x209   :  { %895 = vmatpush3.bf16.msra.mxu0 %v956_v56 }
 0x20a   :  { %896 = vmatprep.subr.bf16.mxu0 %v1120_v0 }
 0x20d   :  { %897 = vmatpush3.bf16.msra.mxu0 %v957_v57 }
 0x20e   :  { %898 = vmatprep.subr.bf16.mxu0 %v1120_v0 }
 0x211   :  { %899 = vmatpush3.bf16.msra.mxu0 %v958_v58 }
 0x212   :  { %900 = vmatprep.subr.bf16.mxu0 %v1120_v0 }
 0x215   :  { %901 = vmatpush3.bf16.msra.mxu0 %v959_v6 }
 0x216   :  { %902 = vmatprep.subr.bf16.mxu0 %v1120_v0 }
 0x219   :  { %903 = vmatpush3.bf16.msra.mxu0 %v960_v7 }
 0x21a   :  { %904 = vmatprep.subr.bf16.mxu0 %v1120_v0  ;;  %v747_v0 = vld [vmem:[%s1276_s6 + $0x4] ss:$0 sm:$0xff] }
 0x21d   :  { %905 = vmatpush3.bf16.msra.mxu0 %v961_v8 }
 0x2c0   :  { %v447_v60 = vpop.f32.mrf.mxu0 }
 0x2c1   :  { %v448_v62 = vadd.f32 %v729_v59, %v447_v60 }
 0x2c2   :  { %v868_v61 = vpop.f32.mrf.mxu0 }
 0x2c3   :  { %v454_v3 = vmax.f32 %v448_v62, 0.0 }
 0x2c4   :  { %v450_v63 = vpop.f32.mrf.mxu0 }
 0x2c5   :  { %v451_v1 = vadd.f32 %v729_v59, %v450_v63 }
 0x2c6   :  { %v869_v2 = vpop.f32.mrf.mxu0 }
 0x2c7   :  { %v455_v4 = vmax.f32 %v451_v1, 0.0 }
 0x2c9   :  { %v456_v5 = vpack.c.bf16 %v455_v4, %v454_v3 }
 0x2cb   :  { %887 = vmatmul.mubr.bf16.vlgmr.msra.gmra.mxu1 %v456_v5 }
 0x38b   :  { %v560_v10 = vpop.f32.mrf.mxu1 }
 0x38c   :  { %v561_v12 = vadd.f32 %v738_v9, %v560_v10 }
 0x38d   :  { %v888_v11 = vpop.f32.mrf.mxu1 }
 0x38e   :  { %v567_v16 = vmax.f32 %v561_v12, 0.0 }
 0x38f   :  { %v563_v13 = vpop.f32.mrf.mxu1 }
 0x390   :  { %v564_v14 = vadd.f32 %v738_v9, %v563_v13 }
 0x391   :  { %v889_v15 = vpop.f32.mrf.mxu1 }
 0x392   :  { %v568_v17 = vmax.f32 %v564_v14, 0.0 }
 0x394   :  { %v569_v18 = vpack.c.bf16 %v568_v17, %v567_v16 }
 0x396   :  { %907 = vmatmul.mubr.bf16.vlgmr.msra.gmra.mxu0 %v569_v18 }
 0x456   :  { %v673_v19 = vpop.f32.mrf.mxu0 }
 0x457   :  { %v674_v22 = vadd.f32 %v747_v0, %v673_v19 }
 0x458   :  { %v908_v20 = vpop.f32.mrf.mxu0 }
 0x45a   :  { %v676_v21 = vpop.f32.mrf.mxu0 }
 0x45b   :  { %v677_v23 = vadd.f32 %v747_v0, %v676_v21 }
 0x45c   :  { %v909_v24 = vpop.f32.mrf.mxu0 }
 0x45d   :  { %v763_v25 = vpack.c.bf16 %v677_v23, %v674_v22 }
 0x45f   :  { %764 = vst [vmem:[#allocation13] sm:$0xff] %v763_v25  }
 0x460   :  { %1093 = shalt.err (!%p1090_p6)
}
 0x461   :  { %701 = dma.vmem_to_hbm [thread:$0]  %s696_s1, 128, %s1277_s7, [#allocation4], %s1114_s29, %s1114_s29, %s1115_s30  }
 0x462   :  { %1110 = dma.done.wait [#allocation4], 128  }
 0x463   :  { %1111 = vsyncadd [#allocation4], 4294967168 }
 0x464   :  { %705 = vsyncpa [#allocation3], 1 }
 0x465   :  { %706 = vsyncpa [#allocation6], 1 }
 0x466   :  { %707 = vsyncpa [#allocation9], 1 }
 0x467   :  { %708 = vsyncpa [#allocation12], 1 }
 0x468   :  { %709 = vsyncpa [#allocation4], 1 }

</bundles_post_ra>
